<compile_context>
chip_gen: v5e
topology: v5e:2x2
jax: 0.10.0
libtpu: 0.0.40
codegen_flags: <defaults>
</compile_context>

<pallas_src>
import functools

import numpy as np
import jax
import jax.numpy as jnp
from jax.experimental import pallas as pl
from jax.experimental.pallas import tpu as pltpu

HIDDEN = 128
_LANE = 128
_SUBLANE = 8

# Tile-sizing knobs.
_MAX_TM = 4096               # rows; amortizes per-grid-step overhead
_MIN_SPLIT_ROWS = 1024       # only split batches this big into >=2 steps (v7x megacore)
_VMEM_BUDGET = 40 << 20      # target bytes for tiles + resident weights when picking TM
_VMEM_LIMIT_CAP = 56 << 20   # scoped-VMEM request cap (below v7x's 64 MiB physical)


def _round_up(n, m):
    return ((n + m - 1) // m) * m


def _cdiv(a, b):
    return -(-a // b)


def _mlp_kernel(x_ref,
                w1_ref, b1_ref,
                w2_ref, b2_ref,
                w3_ref, b3_ref,
                w4_ref, b4_ref,
                out_ref):
    # Weights may be f32 or bf16; dots cast operands to the weight dtype,
    # accumulate in f32 (MXU), and do bias-add / ReLU in f32 on the VPU.
    w1 = w1_ref[...]
    w2 = w2_ref[...]
    w3 = w3_ref[...]
    w4 = w4_ref[...]
    cdt = w1.dtype

    x = x_ref[...].astype(cdt)

    h = jnp.dot(x, w1, preferred_element_type=jnp.float32) + b1_ref[...]
    h = jnp.maximum(h, 0.0)

    h = jnp.dot(h.astype(cdt), w2, preferred_element_type=jnp.float32) + b2_ref[...]
    h = jnp.maximum(h, 0.0)

    h = jnp.dot(h.astype(cdt), w3, preferred_element_type=jnp.float32) + b3_ref[...]
    h = jnp.maximum(h, 0.0)

    logits = jnp.dot(h.astype(cdt), w4, preferred_element_type=jnp.float32) + b4_ref[...]
    out_ref[...] = logits.astype(out_ref.dtype)


def init_params(state_dim, action_dim, seed=0, weight_dtype=jnp.bfloat16):
    """Deterministic PyTorch-nn.Linear-style init (uniform +- 1/sqrt(fan_in)).

    Weights are returned transposed to (in_features, out_features) in
    `weight_dtype` (default bf16: MXU-native on v6e/v7x, halves weight DMA);
    biases stay (1, out_features) float32. Accumulation is always f32.
    """
    key = jax.random.PRNGKey(seed)
    dims = [(state_dim, HIDDEN), (HIDDEN, HIDDEN), (HIDDEN, HIDDEN), (HIDDEN, action_dim)]
    params = []
    for fan_in, fan_out in dims:
        key, kw, kb = jax.random.split(key, 3)
        bound = 1.0 / np.sqrt(fan_in)
        w = jax.random.uniform(kw, (fan_in, fan_out), jnp.float32, -bound, bound)
        b = jax.random.uniform(kb, (1, fan_out), jnp.float32, -bound, bound)
        params.extend([w.astype(weight_dtype), b])
    return params


def prepare_params(params):
    """One-time lane-friendly padding of the weights/biases.

    Call once after init (or after each training update), NOT per forward:
    this keeps the per-inference call free of weight-padding XLA ops/HBM
    copies. Zero-padded rows/cols don't change the math; the padded logits
    lanes are sliced off after the kernel.
    Returns (padded_params_tuple, action_dim).
    """
    w1, b1, w2, b2, w3, b3, w4, b4 = params
    S = w1.shape[0]
    A = w4.shape[1]
    S_pad = _round_up(S, _LANE)
    A_pad = _round_up(A, _LANE)
    w1_p = jnp.pad(w1, ((0, S_pad - S), (0, 0)))
    w4_p = jnp.pad(w4, ((0, 0), (0, A_pad - A)))
    b4_p = jnp.pad(b4, ((0, 0), (0, A_pad - A)))
    return (w1_p, b1, w2, b2, w3, b3, w4_p, b4_p), A


def _tile_config(B, S_pad, A_pad, weight_bytes):
    """Pick a balanced batch tile TM and the VMEM limit to request.

    Per-row cost covers the double-buffered f32 input + output tiles plus a
    headroom term for the in-kernel f32 activation temporaries.
    """
    per_row = 2 * 4 * (S_pad + A_pad) + 6 * 4 * HIDDEN
    avail = max(_VMEM_BUDGET - 2 * weight_bytes, per_row * _SUBLANE)
    tm_cap = (avail // per_row) // _SUBLANE * _SUBLANE
    tm_cap = max(_SUBLANE, min(_MAX_TM, tm_cap))

    rows = _round_up(max(B, 1), _SUBLANE)
    n_tiles = _cdiv(rows, tm_cap)
    # v7x has 2 TensorCores: give the "parallel" batch axis >=2 steps for big
    # batches so both cores get work; small batches stay at grid=(1,).
    if n_tiles == 1 and rows >= _MIN_SPLIT_ROWS:
        n_tiles = 2
    TM = _round_up(_cdiv(rows, n_tiles), _SUBLANE)
    B_pad = n_tiles * TM

    est = TM * per_row + 2 * weight_bytes + (2 << 20)
    vmem_limit = int(min(max(est, 32 << 20), _VMEM_LIMIT_CAP))
    return TM, B_pad, n_tiles, vmem_limit


@functools.partial(jax.jit, static_argnums=(2,))
def _forward_padded(x, padded_params, action_dim):
    """x: (B, S) float32. Returns (B, action_dim) float32 logits."""
    w1_p, b1, w2, b2, w3, b3, w4_p, b4_p = padded_params
    B, S = x.shape
    S_pad = w1_p.shape[0]
    A_pad = w4_p.shape[1]

    weight_bytes = sum(int(np.prod(p.shape)) * p.dtype.itemsize for p in padded_params)
    TM, B_pad, n_tiles, vmem_limit = _tile_config(B, S_pad, A_pad, weight_bytes)

    # Only per-call data prep: zero-pad obs rows (batch) and feature columns.
    x_p = jnp.pad(x, ((0, B_pad - B), (0, S_pad - S)))

    # Activations: one (TM, S_pad) tile per grid step (pipelined / double
    # buffered). Weights & biases: full-array blocks with constant index_map,
    # so they stay VMEM-resident across grid steps (no re-DMA).
    in_specs = [
        pl.BlockSpec((TM, S_pad), lambda i: (i, 0)),
        pl.BlockSpec(w1_p.shape, lambda i: (0, 0)),
        pl.BlockSpec(b1.shape, lambda i: (0, 0)),
        pl.BlockSpec(w2.shape, lambda i: (0, 0)),
        pl.BlockSpec(b2.shape, lambda i: (0, 0)),
        pl.BlockSpec(w3.shape, lambda i: (0, 0)),
        pl.BlockSpec(b3.shape, lambda i: (0, 0)),
        pl.BlockSpec(w4_p.shape, lambda i: (0, 0)),
        pl.BlockSpec(b4_p.shape, lambda i: (0, 0)),
    ]
    out_specs = pl.BlockSpec((TM, A_pad), lambda i: (i, 0))

    cost = pl.CostEstimate(
        flops=2 * B_pad * HIDDEN * (S_pad + 2 * HIDDEN + A_pad),
        transcendentals=0,
        bytes_accessed=B_pad * (S_pad + A_pad) * 4 + weight_bytes,
    )

    logits_padded = pl.pallas_call(
        _mlp_kernel,
        out_shape=jax.ShapeDtypeStruct((B_pad, A_pad), jnp.float32),
        grid=(n_tiles,),
        in_specs=in_specs,
        out_specs=out_specs,
        compiler_params=pltpu.CompilerParams(
            dimension_semantics=("parallel",),
            vmem_limit_bytes=vmem_limit),
        cost_estimate=cost,
    )(x_p, w1_p, b1, w2, b2, w3, b3, w4_p, b4_p)

    return logits_padded[:B, :action_dim]


def net_forward(obs, prepared, state=None):
    """Mirrors Net.forward: flattens obs to (batch, -1), runs the MLP kernel,
    and returns (logits, state). `prepared` comes from prepare_params()."""
    padded_params, action_dim = prepared
    obs = jnp.asarray(obs, dtype=jnp.float32)
    batch = obs.shape[0]
    x = obs.reshape(batch, -1)
    logits = _forward_padded(x, tuple(padded_params), action_dim)
    return logits, state


def _reference_forward(obs, params):
    x = jnp.asarray(obs, jnp.float32).reshape(obs.shape[0], -1)
    w1, b1, w2, b2, w3, b3, w4, b4 = [jnp.asarray(p, jnp.float32) for p in params]
    h = jnp.maximum(x @ w1 + b1, 0.0)
    h = jnp.maximum(h @ w2 + b2, 0.0)
    h = jnp.maximum(h @ w3 + b3, 0.0)
    return h @ w4 + b4


if __name__ == "__main__":
    # Small shapes consistent with the module: a flat observation vector per
    # env (grid4x4 SUMO obs ~ small vector) and a discrete action space.
    batch, state_dim, action_dim = 2, 32, 4

    key = jax.random.PRNGKey(0)
    obs = jax.random.normal(key, (batch, state_dim), dtype=jnp.float32)

    # ---- f32 path: exact check against the pure-JAX reference ----
    params_f32 = init_params(state_dim, action_dim, seed=0, weight_dtype=jnp.float32)
    prepared_f32 = prepare_params(params_f32)
    logits, state = net_forward(obs, prepared_f32, state=None)
    logits = jax.block_until_ready(logits)
    ref = _reference_forward(obs, params_f32)
    np.testing.assert_allclose(np.asarray(logits), np.asarray(ref), rtol=1e-5, atol=1e-5)
    assert logits.shape == (batch, action_dim)
    assert state is None

    # ---- ragged batch (exercises batch/feature padding + grid tiling) ----
    key2 = jax.random.PRNGKey(1)
    obs_big = jax.random.normal(key2, (37, state_dim), dtype=jnp.float32)
    logits_big, _ = net_forward(obs_big, prepared_f32)
    logits_big = jax.block_until_ready(logits_big)
    ref_big = _reference_forward(obs_big, params_f32)
    np.testing.assert_allclose(np.asarray(logits_big), np.asarray(ref_big),
                               rtol=1e-5, atol=1e-5)
    assert logits_big.shape == (37, action_dim)

    # ---- default bf16 MXU-operand path (f32 accumulate): loose tolerance ----
    params_bf16 = init_params(state_dim, action_dim, seed=0)  # bf16 by default
    prepared_bf16 = prepare_params(params_bf16)
    logits_bf16, _ = net_forward(obs, prepared_bf16)
    logits_bf16 = jax.block_until_ready(logits_bf16)
    np.testing.assert_allclose(np.asarray(logits_bf16), np.asarray(ref),
                               rtol=5e-2, atol=5e-2)

    print("KERNEL_OK")
</pallas_src>

<mosaic_0001>
module attributes {stable_mosaic.version = 11 : i64} {
  func.func @_mlp_kernel(%arg0: i32, %arg1: memref<8x128xf32, #tpu.memory_space<vmem>>, %arg2: memref<128x128xf32, #tpu.memory_space<vmem>>, %arg3: memref<1x128xf32, #tpu.memory_space<vmem>>, %arg4: memref<128x128xf32, #tpu.memory_space<vmem>>, %arg5: memref<1x128xf32, #tpu.memory_space<vmem>>, %arg6: memref<128x128xf32, #tpu.memory_space<vmem>>, %arg7: memref<1x128xf32, #tpu.memory_space<vmem>>, %arg8: memref<128x128xf32, #tpu.memory_space<vmem>>, %arg9: memref<1x128xf32, #tpu.memory_space<vmem>>, %arg10: memref<8x128xf32, #tpu.memory_space<vmem>>) attributes {dimension_semantics = [#tpu.dimension_semantics<parallel>], iteration_bounds = array<i64: 1>, scalar_prefetch = 0 : i64, scratch_operands = 0 : i64, tpu.core_type = #tpu.core_type<tc>, window_params = [{transform_indices = @transform_0, window_bounds = array<i64: 8, 128>}, {pipeline_mode = #tpu.pipeline_mode<synchronous>, transform_indices = @transform_1, window_bounds = array<i64: 128, 128>}, {pipeline_mode = #tpu.pipeline_mode<synchronous>, transform_indices = @transform_2, window_bounds = array<i64: 1, 128>}, {pipeline_mode = #tpu.pipeline_mode<synchronous>, transform_indices = @transform_3, window_bounds = array<i64: 128, 128>}, {pipeline_mode = #tpu.pipeline_mode<synchronous>, transform_indices = @transform_4, window_bounds = array<i64: 1, 128>}, {pipeline_mode = #tpu.pipeline_mode<synchronous>, transform_indices = @transform_5, window_bounds = array<i64: 128, 128>}, {pipeline_mode = #tpu.pipeline_mode<synchronous>, transform_indices = @transform_6, window_bounds = array<i64: 1, 128>}, {pipeline_mode = #tpu.pipeline_mode<synchronous>, transform_indices = @transform_7, window_bounds = array<i64: 128, 128>}, {pipeline_mode = #tpu.pipeline_mode<synchronous>, transform_indices = @transform_8, window_bounds = array<i64: 1, 128>}, {transform_indices = @transform_9, window_bounds = array<i64: 8, 128>}]} {
    %c0 = arith.constant 0 : index
    %c0_0 = arith.constant 0 : index
    %0 = vector.load %arg2[%c0, %c0_0] : memref<128x128xf32, #tpu.memory_space<vmem>>, vector<128x128xf32>
    %c0_1 = arith.constant 0 : index
    %c0_2 = arith.constant 0 : index
    %1 = vector.load %arg4[%c0_1, %c0_2] : memref<128x128xf32, #tpu.memory_space<vmem>>, vector<128x128xf32>
    %c0_3 = arith.constant 0 : index
    %c0_4 = arith.constant 0 : index
    %2 = vector.load %arg6[%c0_3, %c0_4] : memref<128x128xf32, #tpu.memory_space<vmem>>, vector<128x128xf32>
    %c0_5 = arith.constant 0 : index
    %c0_6 = arith.constant 0 : index
    %3 = vector.load %arg8[%c0_5, %c0_6] : memref<128x128xf32, #tpu.memory_space<vmem>>, vector<128x128xf32>
    %c0_7 = arith.constant 0 : index
    %c0_8 = arith.constant 0 : index
    %4 = vector.load %arg1[%c0_7, %c0_8] : memref<8x128xf32, #tpu.memory_space<vmem>>, vector<8x128xf32>
    %cst = arith.constant dense<0.000000e+00> : vector<8x128xf32>
    %5 = tpu.matmul %4, %0, %cst {dimension_numbers = #tpu.dot_dimension_numbers<[1], [0], [0], [1], [0, 0, 1, 1], [], []>} : vector<8x128xf32>, vector<128x128xf32>, vector<8x128xf32> -> vector<8x128xf32>
    %c0_9 = arith.constant 0 : index
    %c0_10 = arith.constant 0 : index
    %6 = vector.load %arg3[%c0_9, %c0_10] : memref<1x128xf32, #tpu.memory_space<vmem>>, vector<1x128xf32>
    %7 = vector.broadcast %6 : vector<1x128xf32> to vector<8x128xf32>
    %8 = arith.addf %5, %7 : vector<8x128xf32>
    %cst_11 = arith.constant 0.000000e+00 : f32
    %9 = vector.broadcast %cst_11 : f32 to vector<8x128xf32>
    %10 = arith.maximumf %8, %9 : vector<8x128xf32>
    %cst_12 = arith.constant dense<0.000000e+00> : vector<8x128xf32>
    %11 = tpu.matmul %10, %1, %cst_12 {dimension_numbers = #tpu.dot_dimension_numbers<[1], [0], [0], [1], [0, 0, 1, 1], [], []>} : vector<8x128xf32>, vector<128x128xf32>, vector<8x128xf32> -> vector<8x128xf32>
    %c0_13 = arith.constant 0 : index
    %c0_14 = arith.constant 0 : index
    %12 = vector.load %arg5[%c0_13, %c0_14] : memref<1x128xf32, #tpu.memory_space<vmem>>, vector<1x128xf32>
    %13 = vector.broadcast %12 : vector<1x128xf32> to vector<8x128xf32>
    %14 = arith.addf %11, %13 : vector<8x128xf32>
    %cst_15 = arith.constant 0.000000e+00 : f32
    %15 = vector.broadcast %cst_15 : f32 to vector<8x128xf32>
    %16 = arith.maximumf %14, %15 : vector<8x128xf32>
    %cst_16 = arith.constant dense<0.000000e+00> : vector<8x128xf32>
    %17 = tpu.matmul %16, %2, %cst_16 {dimension_numbers = #tpu.dot_dimension_numbers<[1], [0], [0], [1], [0, 0, 1, 1], [], []>} : vector<8x128xf32>, vector<128x128xf32>, vector<8x128xf32> -> vector<8x128xf32>
    %c0_17 = arith.constant 0 : index
    %c0_18 = arith.constant 0 : index
    %18 = vector.load %arg7[%c0_17, %c0_18] : memref<1x128xf32, #tpu.memory_space<vmem>>, vector<1x128xf32>
    %19 = vector.broadcast %18 : vector<1x128xf32> to vector<8x128xf32>
    %20 = arith.addf %17, %19 : vector<8x128xf32>
    %cst_19 = arith.constant 0.000000e+00 : f32
    %21 = vector.broadcast %cst_19 : f32 to vector<8x128xf32>
    %22 = arith.maximumf %20, %21 : vector<8x128xf32>
    %cst_20 = arith.constant dense<0.000000e+00> : vector<8x128xf32>
    %23 = tpu.matmul %22, %3, %cst_20 {dimension_numbers = #tpu.dot_dimension_numbers<[1], [0], [0], [1], [0, 0, 1, 1], [], []>} : vector<8x128xf32>, vector<128x128xf32>, vector<8x128xf32> -> vector<8x128xf32>
    %c0_21 = arith.constant 0 : index
    %c0_22 = arith.constant 0 : index
    %24 = vector.load %arg9[%c0_21, %c0_22] : memref<1x128xf32, #tpu.memory_space<vmem>>, vector<1x128xf32>
    %25 = vector.broadcast %24 : vector<1x128xf32> to vector<8x128xf32>
    %26 = arith.addf %23, %25 : vector<8x128xf32>
    %c0_23 = arith.constant 0 : index
    %c0_24 = arith.constant 0 : index
    %27 = vector.load %arg10[%c0_23, %c0_24] : memref<8x128xf32, #tpu.memory_space<vmem>>, vector<8x128xf32>
    tpu.vector_store %arg10[%c0_23, %c0_24], %26 {strides = array<i32>} : memref<8x128xf32, #tpu.memory_space<vmem>>, vector<8x128xf32>,
    return
  }
  func.func @transform_0(%arg0: i32) -> (i32, i32) {
    %c0_i32 = arith.constant 0 : i32
    %c0_i32_0 = arith.constant 0 : i32
    return %arg0, %c0_i32 : i32, i32
  }
  func.func @transform_1(%arg0: i32) -> (i32, i32) {
    %c0_i32 = arith.constant 0 : i32
    %c0_i32_0 = arith.constant 0 : i32
    %c0_i32_1 = arith.constant 0 : i32
    return %c0_i32, %c0_i32_0 : i32, i32
  }
  func.func @transform_2(%arg0: i32) -> (i32, i32) {
    %c0_i32 = arith.constant 0 : i32
    %c0_i32_0 = arith.constant 0 : i32
    %c0_i32_1 = arith.constant 0 : i32
    return %c0_i32, %c0_i32_0 : i32, i32
  }
  func.func @transform_3(%arg0: i32) -> (i32, i32) {
    %c0_i32 = arith.constant 0 : i32
    %c0_i32_0 = arith.constant 0 : i32
    %c0_i32_1 = arith.constant 0 : i32
    return %c0_i32, %c0_i32_0 : i32, i32
  }
  func.func @transform_4(%arg0: i32) -> (i32, i32) {
    %c0_i32 = arith.constant 0 : i32
    %c0_i32_0 = arith.constant 0 : i32
    %c0_i32_1 = arith.constant 0 : i32
    return %c0_i32, %c0_i32_0 : i32, i32
  }
  func.func @transform_5(%arg0: i32) -> (i32, i32) {
    %c0_i32 = arith.constant 0 : i32
    %c0_i32_0 = arith.constant 0 : i32
    %c0_i32_1 = arith.constant 0 : i32
    return %c0_i32, %c0_i32_0 : i32, i32
  }
  func.func @transform_6(%arg0: i32) -> (i32, i32) {
    %c0_i32 = arith.constant 0 : i32
    %c0_i32_0 = arith.constant 0 : i32
    %c0_i32_1 = arith.constant 0 : i32
    return %c0_i32, %c0_i32_0 : i32, i32
  }
  func.func @transform_7(%arg0: i32) -> (i32, i32) {
    %c0_i32 = arith.constant 0 : i32
    %c0_i32_0 = arith.constant 0 : i32
    %c0_i32_1 = arith.constant 0 : i32
    return %c0_i32, %c0_i32_0 : i32, i32
  }
  func.func @transform_8(%arg0: i32) -> (i32, i32) {
    %c0_i32 = arith.constant 0 : i32
    %c0_i32_0 = arith.constant 0 : i32
    %c0_i32_1 = arith.constant 0 : i32
    return %c0_i32, %c0_i32_0 : i32, i32
  }
  func.func @transform_9(%arg0: i32) -> (i32, i32) {
    %c0_i32 = arith.constant 0 : i32
    %c0_i32_0 = arith.constant 0 : i32
    return %arg0, %c0_i32 : i32, i32
  }
}

</mosaic_0001>

<bundles_post_ra>
// kernel: _forward_padded.1
= control target key start
LH: loop header
LB: loop body
LE: loop exit
PB: predicated region body
PF: predicated region fallthrough
CT: control target
= control target key end

     0   :  { %14 = vsyncpa [#allocation3], 0  ;;  %s465_s0 = inlined_call_operand.vmem [shape: f32[8,128], index: 0, kind: input, shape index: {}]   ;;  %s466_s1 = inlined_call_operand.hbm [shape: f32[128,128], index: 1, kind: input, shape index: {}]   ;;  %s467_s2 = inlined_call_operand.vmem [shape: f32[1,128], index: 2, kind: input, shape index: {}]   ;;  %s468_s3 = inlined_call_operand.hbm [shape: f32[128,128], index: 3, kind: input, shape index: {}]   ;;  %s469_s4 = inlined_call_operand.vmem [shape: f32[1,128], index: 4, kind: input, shape index: {}]   ;;  %s470_s5 = inlined_call_operand.hbm [shape: f32[128,128], index: 5, kind: input, shape index: {}]   ;;  %s471_s6 = inlined_call_operand.vmem [shape: f32[1,128], index: 6, kind: input, shape index: {}]   ;;  %s472_s7 = inlined_call_operand.hbm [shape: f32[128,128], index: 7, kind: input, shape index: {}]   ;;  %s473_s8 = inlined_call_operand.vmem [shape: f32[1,128], index: 8, kind: input, shape index: {}]   ;;  %s474_s9 = inlined_call_operand.vmem [shape: f32[8,128], index: 9, kind: output, shape index: {}]  }
   0x1   :  { %15 = vsyncpa [#allocation5], 0 }
   0x2   :  { %16 = vsyncpa [#allocation8], 0  ;;  %s38_s11 = sshll.u32 %s468_s3, 4  ;;  %s379_s12 = smov [#allocation4]   ;;  %s39_s11 = int_to_ptr.hbm [resolvable:$true] %s38_s11 }
   0x3   :  { %s40_s13 = sshll.u32 %s379_s12, 4  ;;  %s23_s16 = sshll.u32 %s466_s1, 4  ;;  %s41_s13 = int_to_ptr.vmem [resolvable:$true] %s40_s13  ;;  %s24_s16 = int_to_ptr.hbm [resolvable:$true] %s23_s16 }
   0x4   :  { %s380_s17 = smov 128   ;;  %s381_s18 = smov 8  }
   0x5   :  { %46 = dma.hbm_to_vmem [thread:$0]  %s39_s11, 2048, %s41_s13, [#allocation5], %s380_s17, %s380_s17, %s381_s18  }
   0x6   :  { %s382_s19 = smov [#allocation2]   ;;  %s53_s23 = sshll.u32 %s470_s5, 4  ;;  %s54_s23 = int_to_ptr.hbm [resolvable:$true] %s53_s23 }
   0x7   :  { %s25_s20 = sshll.u32 %s382_s19, 4  ;;  %s68_s25 = sshll.u32 %s472_s7, 4  ;;  %s26_s20 = int_to_ptr.vmem [resolvable:$true] %s25_s20  ;;  %s69_s25 = int_to_ptr.hbm [resolvable:$true] %s68_s25 }
   0x8   :  { %31 = dma.hbm_to_vmem [thread:$0]  %s24_s16, 2048, %s26_s20, [#allocation3], %s380_s17, %s380_s17, %s381_s18  }
   0x9   :  { %s383_s26 = smov [#allocation6]   ;;  %s384_s1 = smov [#allocation7]  }
   0xa   :  { %s55_s27 = sshll.u32 %s383_s26, 4  ;;  %s70_s28 = sshll.u32 %s384_s1, 4  ;;  %s56_s27 = int_to_ptr.vmem [resolvable:$true] %s55_s27  ;;  %s71_s28 = int_to_ptr.vmem [resolvable:$true] %s70_s28 }
   0xb   :  { %61 = dma.hbm_to_vmem [thread:$0]  %s54_s23, 2048, %s56_s27, [#allocation5], %s380_s17, %s380_s17, %s381_s18  }
   0xc   :  { %76 = dma.hbm_to_vmem [thread:$0]  %s69_s25, 2048, %s71_s28, [#allocation8], %s380_s17, %s380_s17, %s381_s18  }
   0xd   :  { %373 = dma.done.wait [#allocation3], 2048  }
   0xe   :  { %374 = vsyncadd [#allocation3], 4294965248 }
   0xf   :  { %375 = dma.done.wait [#allocation5], 4096  }
  0x10   :  { %376 = vsyncadd [#allocation5], 4294963200 }
  0x11   :  { %377 = dma.done.wait [#allocation8], 2048  }
  0x12   :  { %378 = vsyncadd [#allocation8], 4294965248  ;;  %v110_v0 = vld [vmem:[#allocation2 + $0x78] sm:$0xff]  ;;  %v109_v1 = vld [vmem:[#allocation2 + $0x70] sm:$0xff] }
  0x13   :  { %164 = vmatpush.msra.mxu0 %v110_v0  ;;  %v108_v2 = vld [vmem:[#allocation2 + $0x68] sm:$0xff]  ;;  %v107_v3 = vld [vmem:[#allocation2 + $0x60] sm:$0xff]  ;;  %v126_v4 = vld [vmem:[#allocation4 + $0x78] sm:$0xff] }
  0x14   :  { %v106_v5 = vld [vmem:[#allocation2 + $0x58] sm:$0xff]  ;;  %189 = vmatpush.msra.mxu1 %v126_v4  ;;  %v125_v6 = vld [vmem:[#allocation4 + $0x70] sm:$0xff]  ;;  %v124_v7 = vld [vmem:[#allocation4 + $0x68] sm:$0xff] }
  0x15   :  { %165 = vmatpush.msra.mxu0 %v109_v1  ;;  %v105_v8 = vld [vmem:[#allocation2 + $0x50] sm:$0xff]  ;;  %v123_v9 = vld [vmem:[#allocation4 + $0x60] sm:$0xff]  ;;  %v104_v10 = vld [vmem:[#allocation2 + $0x48] sm:$0xff] }
  0x16   :  { %190 = vmatpush.msra.mxu1 %v125_v6  ;;  %v122_v11 = vld [vmem:[#allocation4 + $0x58] sm:$0xff]  ;;  %v103_v12 = vld [vmem:[#allocation2 + $0x40] sm:$0xff]  ;;  %v121_v13 = vld [vmem:[#allocation4 + $0x50] sm:$0xff] }
  0x17   :  { %166 = vmatpush.msra.mxu0 %v108_v2  ;;  %v102_v14 = vld [vmem:[#allocation2 + $0x38] sm:$0xff]  ;;  %v120_v15 = vld [vmem:[#allocation4 + $0x48] sm:$0xff]  ;;  %v101_v16 = vld [vmem:[#allocation2 + $0x30] sm:$0xff] }
  0x18   :  { %191 = vmatpush.msra.mxu1 %v124_v7  ;;  %v119_v17 = vld [vmem:[#allocation4 + $0x40] sm:$0xff]  ;;  %v100_v18 = vld [vmem:[#allocation2 + $0x28] sm:$0xff]  ;;  %v118_v19 = vld [vmem:[#allocation4 + $0x38] sm:$0xff] }
  0x19   :  { %167 = vmatpush.msra.mxu0 %v107_v3  ;;  %v99_v20 = vld [vmem:[#allocation2 + $0x20] sm:$0xff]  ;;  %v117_v21 = vld [vmem:[#allocation4 + $0x30] sm:$0xff]  ;;  %v98_v22 = vld [vmem:[#allocation2 + $0x18] sm:$0xff] }
  0x1a   :  { %192 = vmatpush.msra.mxu1 %v123_v9  ;;  %v116_v23 = vld [vmem:[#allocation4 + $0x28] sm:$0xff]  ;;  %v97_v24 = vld [vmem:[#allocation2 + $0x10] sm:$0xff]  ;;  %v115_v25 = vld [vmem:[#allocation4 + $0x20] sm:$0xff] }
  0x1b   :  { %168 = vmatpush.msra.mxu0 %v106_v5  ;;  %v96_v26 = vld [vmem:[#allocation2 + $0x8] sm:$0xff]  ;;  %v114_v27 = vld [vmem:[#allocation4 + $0x18] sm:$0xff]  ;;  %v95_v28 = vld [vmem:[#allocation2] sm:$0xff] }
  0x1c   :  { %193 = vmatpush.msra.mxu1 %v122_v11  ;;  %v159_v29 = vld [vmem:[%s465_s0] sm:$0xff]  ;;  %v113_v30 = vld [vmem:[#allocation4 + $0x10] sm:$0xff]  ;;  %v112_v31 = vld [vmem:[#allocation4 + $0x8] sm:$0xff] }
  0x1d   :  { %169 = vmatpush.msra.mxu0 %v105_v8  ;;  %v111_v32 = vld [vmem:[#allocation4] sm:$0xff]  ;;  %v142_v33 = vld [vmem:[#allocation6 + $0x78] sm:$0xff]  ;;  %v141_v34 = vld [vmem:[#allocation6 + $0x70] sm:$0xff] }
  0x1e   :  { %194 = vmatpush.msra.mxu1 %v121_v13  ;;  %214 = vmatpush.msra.mxu2 %v142_v33  ;;  %v140_v35 = vld [vmem:[#allocation6 + $0x68] sm:$0xff]  ;;  %v139_v36 = vld [vmem:[#allocation6 + $0x60] sm:$0xff]  ;;  %v138_v37 = vld [vmem:[#allocation6 + $0x58] sm:$0xff] }
  0x1f   :  { %170 = vmatpush.msra.mxu0 %v104_v10  ;;  %v137_v38 = vld [vmem:[#allocation6 + $0x50] sm:$0xff]  ;;  %v136_v39 = vld [vmem:[#allocation6 + $0x48] sm:$0xff]  ;;  %v135_v40 = vld [vmem:[#allocation6 + $0x40] sm:$0xff] }
  0x20   :  { %195 = vmatpush.msra.mxu1 %v120_v15  ;;  %215 = vmatpush.msra.mxu2 %v141_v34  ;;  %v134_v41 = vld [vmem:[#allocation6 + $0x38] sm:$0xff]  ;;  %v133_v42 = vld [vmem:[#allocation6 + $0x30] sm:$0xff]  ;;  %v132_v43 = vld [vmem:[#allocation6 + $0x28] sm:$0xff] }
  0x21   :  { %171 = vmatpush.msra.mxu0 %v103_v12  ;;  %v131_v44 = vld [vmem:[#allocation6 + $0x20] sm:$0xff]  ;;  %v130_v45 = vld [vmem:[#allocation6 + $0x18] sm:$0xff]  ;;  %v129_v50 = vld [vmem:[#allocation6 + $0x10] sm:$0xff] }
  0x22   :  { %196 = vmatpush.msra.mxu1 %v119_v17  ;;  %216 = vmatpush.msra.mxu2 %v140_v35  ;;  %v273_v46 = vld [vmem:[%s467_s2] ss:$0 sm:$0xff]  ;;  %v128_v51 = vld [vmem:[#allocation6 + $0x8] sm:$0xff]  ;;  %v158_v53 = vld [vmem:[#allocation7 + $0x78] sm:$0xff] }
  0x23   :  { %172 = vmatpush.msra.mxu0 %v102_v14  ;;  %v127_v52 = vld [vmem:[#allocation6] sm:$0xff]  ;;  %v157_v54 = vld [vmem:[#allocation7 + $0x70] sm:$0xff]  ;;  %239 = vmatpush.msra.mxu3 %v158_v53  ;;  %v156_v55 = vld [vmem:[#allocation7 + $0x68] sm:$0xff] }
  0x24   :  { %197 = vmatpush.msra.mxu1 %v118_v19  ;;  %217 = vmatpush.msra.mxu2 %v139_v36  ;;  %v155_v56 = vld [vmem:[#allocation7 + $0x60] sm:$0xff]  ;;  %v154_v57 = vld [vmem:[#allocation7 + $0x58] sm:$0xff]  ;;  %v153_v58 = vld [vmem:[#allocation7 + $0x50] sm:$0xff] }
  0x25   :  { %173 = vmatpush.msra.mxu0 %v101_v16  ;;  %240 = vmatpush.msra.mxu3 %v157_v54  ;;  %v152_v59 = vld [vmem:[#allocation7 + $0x48] sm:$0xff]  ;;  %v151_v60 = vld [vmem:[#allocation7 + $0x40] sm:$0xff]  ;;  %v150_v61 = vld [vmem:[#allocation7 + $0x38] sm:$0xff] }
  0x26   :  { %198 = vmatpush.msra.mxu1 %v117_v21  ;;  %218 = vmatpush.msra.mxu2 %v138_v37  ;;  %v149_v62 = vld [vmem:[#allocation7 + $0x30] sm:$0xff]  ;;  %v148_v63 = vld [vmem:[#allocation7 + $0x28] sm:$0xff]  ;;  %v147_v0 = vld [vmem:[#allocation7 + $0x20] sm:$0xff] }
  0x27   :  { %174 = vmatpush.msra.mxu0 %v100_v18  ;;  %241 = vmatpush.msra.mxu3 %v156_v55  ;;  %v146_v1 = vld [vmem:[#allocation7 + $0x18] sm:$0xff]  ;;  %v274_v2 = vld [vmem:[%s469_s4] ss:$0 sm:$0xff]  ;;  %v145_v6 = vld [vmem:[#allocation7 + $0x10] sm:$0xff] }
  0x28   :  { %199 = vmatpush.msra.mxu1 %v116_v23  ;;  %219 = vmatpush.msra.mxu2 %v137_v38  ;;  %v144_v7 = vld [vmem:[#allocation7 + $0x8] sm:$0xff]  ;;  %v143_v8 = vld [vmem:[#allocation7] sm:$0xff] }
  0x29   :  { %175 = vmatpush.msra.mxu0 %v99_v20  ;;  %242 = vmatpush.msra.mxu3 %v155_v56  ;;  %v275_v9 = vld [vmem:[%s471_s6] ss:$0 sm:$0xff] }
  0x2a   :  { %200 = vmatpush.msra.mxu1 %v115_v25  ;;  %220 = vmatpush.msra.mxu2 %v136_v39  ;;  %v276_v13 = vld [vmem:[%s473_s8] ss:$0 sm:$0xff] }
  0x2b   :  { %176 = vmatpush.msra.mxu0 %v98_v22  ;;  %243 = vmatpush.msra.mxu3 %v154_v57 }
  0x2c   :  { %201 = vmatpush.msra.mxu1 %v114_v27  ;;  %221 = vmatpush.msra.mxu2 %v135_v40 }
  0x2d   :  { %177 = vmatpush.msra.mxu0 %v97_v24  ;;  %244 = vmatpush.msra.mxu3 %v153_v58 }
  0x2e   :  { %202 = vmatpush.msra.mxu1 %v113_v30  ;;  %222 = vmatpush.msra.mxu2 %v134_v41 }
  0x2f   :  { %178 = vmatpush.msra.mxu0 %v96_v26  ;;  %245 = vmatpush.msra.mxu3 %v152_v59 }
  0x30   :  { %203 = vmatpush.msra.mxu1 %v112_v31  ;;  %223 = vmatpush.msra.mxu2 %v133_v42 }
  0x31   :  { %179 = vmatpush.msra.mxu0 %v95_v28  ;;  %246 = vmatpush.msra.mxu3 %v151_v60 }
  0x32   :  { %180 = vmatmul.f32.vlgmr.msra.gmra.mxu0 %v159_v29  ;;  %204 = vmatpush.msra.mxu1 %v111_v32 }
  0x33   :  { %224 = vmatpush.msra.mxu2 %v132_v43  ;;  %247 = vmatpush.msra.mxu3 %v150_v61 }
  0x35   :  { %225 = vmatpush.msra.mxu2 %v131_v44  ;;  %248 = vmatpush.msra.mxu3 %v149_v62 }
  0x37   :  { %226 = vmatpush.msra.mxu2 %v130_v45  ;;  %249 = vmatpush.msra.mxu3 %v148_v63 }
  0x39   :  { %227 = vmatpush.msra.mxu2 %v129_v50  ;;  %250 = vmatpush.msra.mxu3 %v147_v0 }
  0x3b   :  { %228 = vmatpush.msra.mxu2 %v128_v51  ;;  %251 = vmatpush.msra.mxu3 %v146_v1 }
  0x3d   :  { %229 = vmatpush.msra.mxu2 %v127_v52  ;;  %252 = vmatpush.msra.mxu3 %v145_v6 }
  0x3f   :  { %253 = vmatpush.msra.mxu3 %v144_v7 }
  0x41   :  { %254 = vmatpush.msra.mxu3 %v143_v8 }
  0xaf   :  { %v181_v47 = vpop.f32.mrf.mxu0 }
  0xb0   :  { %v182_v48 = vadd.f32 %v273_v46, %v181_v47 }
  0xb2   :  { %v184_v49 = vmax.f32 %v182_v48, 0.0 }
  0xb4   :  { %205 = vmatmul.f32.vlgmr.msra.gmra.mxu1 %v184_v49 }
 0x131   :  { %v206_v3 = vpop.f32.mrf.mxu1 }
 0x132   :  { %v207_v4 = vadd.f32 %v274_v2, %v206_v3 }
 0x134   :  { %v209_v5 = vmax.f32 %v207_v4, 0.0 }
 0x136   :  { %230 = vmatmul.f32.vlgmr.msra.gmra.mxu2 %v209_v5 }
 0x1b9   :  { %v231_v10 = vpop.f32.mrf.mxu2 }
 0x1ba   :  { %v232_v11 = vadd.f32 %v275_v9, %v231_v10 }
 0x1bc   :  { %v234_v12 = vmax.f32 %v232_v11, 0.0 }
 0x1be   :  { %255 = vmatmul.f32.vlgmr.msra.gmra.mxu3 %v234_v12 }
 0x241   :  { %v256_v14 = vpop.f32.mrf.mxu3 }
 0x242   :  { %v257_v15 = vadd.f32 %v276_v13, %v256_v14 }
 0x244   :  { %259 = vst [vmem:[%s474_s9] sm:$0xff] %v257_v15 }
 0x245   :  { %264 = vsyncpa [#allocation3], 1 }
 0x246   :  { %265 = vsyncpa [#allocation5], 1 }
 0x247   :  { %266 = vsyncpa [#allocation8], 1 }

</bundles_post_ra>
